<compile_context>
chip_gen: v7x
topology: tpu7x:2x2x1
jax: 0.10.0
libtpu: 0.0.40
codegen_flags: <defaults>
</compile_context>

<pallas_src>
import jax
import jax.numpy as jnp
from jax.experimental import pallas as pl
from jax.experimental.pallas import tpu as pltpu

HIDDEN_SIZE = 256
INPUT_SIZE = 100


def _discriminator_kernel(x_ref, w1_ref, b1_ref, w2_ref, b2_ref,
                          w3_ref, b3_ref, o_ref):
    # x tile: (bt, F).  Weight blocks have constant index maps, so they stay
    # resident in VMEM across the whole grid (~200-400 KiB -- negligible).
    x = x_ref[...]

    # fc1 + ReLU.  Cast activations to the weight dtype in-kernel (bf16 on the
    # default path; no-op for f32); accumulate in f32 on the MXU.
    h1 = jnp.dot(x.astype(w1_ref.dtype), w1_ref[...],
                 preferred_element_type=jnp.float32)
    h1 = jnp.maximum(h1 + b1_ref[...].astype(jnp.float32), 0.0)

    # fc2 + ReLU.
    h2 = jnp.dot(h1.astype(w2_ref.dtype), w2_ref[...],
                 preferred_element_type=jnp.float32)
    h2 = jnp.maximum(h2 + b2_ref[...].astype(jnp.float32), 0.0)

    # fc3 has a single output feature: an N=1 matmul would occupy a full MXU
    # pass for 1/256 of its output lanes.  Do it as a VPU multiply + cross-lane
    # (XLU) reduction instead -- those slots are idle while fc1/fc2 own the MXU.
    logit = jnp.sum(h2 * w3_ref[...].astype(jnp.float32),
                    axis=-1, keepdims=True) + b3_ref[0]
    o_ref[...] = jax.nn.sigmoid(logit)


def discriminator_forward(x, params, *, batch_tile=2048,
                          compute_dtype=jnp.bfloat16):
    """x: (B, INPUT_SIZE) float32 -> (B, 1) float32.

    batch_tile: rows per grid step (multiple of 8).  Large tiles amortize the
    ~0.35 us per-grid-step pipeline overhead; VMEM is not a limiter anywhere
    (even bt=4096 bf16 is ~2 MiB double-buffered plus ~200 KiB of weights).
    The tile is clamped so the grid keeps >= 2 steps when the batch allows,
    so both v7x TensorCores get work on the "parallel" axis.

    compute_dtype: bf16 (default) uses bf16 MXU operands for fc1/fc2 with f32
    accumulation -- expect ~1e-2-level relative error vs. the f32 reference.
    jnp.float32 is bit-exact vs. the f32 reference.
    """
    w1, b1, w2, b2, w3_row, b3 = params
    B, F = x.shape
    Fw, H = w1.shape
    assert Fw == F

    # bf16 operands for the two big matmuls; biases / W3 row / epilogue stay f32.
    if compute_dtype != jnp.float32:
        w1 = w1.astype(compute_dtype)
        w2 = w2.astype(compute_dtype)

    # Batch tile: multiple of 8 sublanes, clamped so the grid has >= 2 steps
    # whenever B > 8 (v7x megacore), and never larger than needed.
    half = ((B + 1) // 2 + 7) // 8 * 8           # round_up(cdiv(B, 2), 8)
    bt = max(8, min(int(batch_tile) // 8 * 8, half))
    grid = (pl.cdiv(B, bt),)

    itemsize = jnp.dtype(compute_dtype).itemsize
    cost = pl.CostEstimate(
        flops=2 * B * (F * H + H * H + H),
        transcendentals=B,  # sigmoid
        bytes_accessed=(B * F * 4                       # x (f32 in HBM)
                        + (F * H + H * H) * itemsize    # W1, W2
                        + (2 * H + H + 1) * 4           # b1, b2, W3 row, b3
                        + B * 4),                       # output
    )

    out = pl.pallas_call(
        _discriminator_kernel,
        out_shape=jax.ShapeDtypeStruct((B, 1), jnp.float32),
        grid_spec=pltpu.PrefetchScalarGridSpec(
            num_scalar_prefetch=0,
            grid=grid,
            in_specs=[
                pl.BlockSpec((bt, F), lambda i: (i, 0)),              # x tile
                pl.BlockSpec((F, H),  lambda i: (0, 0)),              # W1
                pl.BlockSpec((1, H),  lambda i: (0, 0)),              # b1
                pl.BlockSpec((H, H),  lambda i: (0, 0)),              # W2
                pl.BlockSpec((1, H),  lambda i: (0, 0)),              # b2
                pl.BlockSpec((1, H),  lambda i: (0, 0)),              # W3 row
                pl.BlockSpec(memory_space=pltpu.MemorySpace.SMEM),    # b3
            ],
            out_specs=pl.BlockSpec((bt, 1), lambda i: (i, 0)),
        ),
        compiler_params=pltpu.CompilerParams(
            dimension_semantics=("parallel",),
        ),
        cost_estimate=cost,
    )(x, w1, b1, w2, b2, w3_row, b3)

    # Output is exactly (B, 1): the ragged last block's out-of-bounds rows are
    # clipped by the output DMA and never written.
    return out


def init_params(key, input_size=INPUT_SIZE, hidden_size=HIDDEN_SIZE):
    """Deterministic init mimicking nn.Linear's U(-1/sqrt(fan_in), +1/sqrt(fan_in))."""
    ks = jax.random.split(key, 6)

    def linear_t(kw, kb, fan_in, fan_out):
        bound = 1.0 / jnp.sqrt(fan_in)
        # Stored already transposed: (fan_in, fan_out).
        w = jax.random.uniform(kw, (fan_in, fan_out), jnp.float32, -bound, bound)
        b = jax.random.uniform(kb, (1, fan_out), jnp.float32, -bound, bound)
        return w, b

    w1, b1 = linear_t(ks[0], ks[1], input_size, hidden_size)
    w2, b2 = linear_t(ks[2], ks[3], hidden_size, hidden_size)

    # fc3: keep the PyTorch (out=1, in=hidden) row layout for the VPU/XLU
    # reduction; bias as a flat scalar array for SMEM.
    bound3 = 1.0 / jnp.sqrt(hidden_size)
    w3_row = jax.random.uniform(ks[4], (1, hidden_size), jnp.float32,
                                -bound3, bound3)
    b3 = jax.random.uniform(ks[5], (1,), jnp.float32, -bound3, bound3)
    return (w1, b1, w2, b2, w3_row, b3)


def _reference_forward(x, params):
    w1, b1, w2, b2, w3_row, b3 = params
    h1 = jnp.maximum(x @ w1 + b1, 0.0)
    h2 = jnp.maximum(h1 @ w2 + b2, 0.0)
    return jax.nn.sigmoid(h2 @ w3_row.T + b3)


if __name__ == "__main__":
    key = jax.random.PRNGKey(0)
    k_param, k_x = jax.random.split(key)

    # Small, deliberately non-tile-multiple batch: exercises the >=2-step grid
    # (bt clamps to 32 -> grid=(2,)) and the ragged last block (50 % 32 != 0)
    # without any wrapper padding.
    B = 50
    params = init_params(k_param)
    x = jax.random.normal(k_x, (B, INPUT_SIZE), dtype=jnp.float32)
    ref = _reference_forward(x, params)

    # Default (bf16 MXU operands, f32 accumulation + epilogue).
    out_bf16 = discriminator_forward(x, params)
    out_bf16 = jax.block_until_ready(out_bf16)
    assert out_bf16.shape == (B, 1)
    assert jnp.allclose(out_bf16, ref, atol=3e-2, rtol=3e-2)

    # Bit-exact f32 path.
    out_f32 = discriminator_forward(x, params, compute_dtype=jnp.float32)
    out_f32 = jax.block_until_ready(out_f32)
    assert out_f32.shape == (B, 1)
    assert jnp.allclose(out_f32, ref, atol=1e-5, rtol=1e-5)

    print("KERNEL_OK")
</pallas_src>

<mosaic_0001>
module attributes {stable_mosaic.version = 11 : i64} {
  func.func @_discriminator_kernel(%arg0: i32, %arg1: memref<32x100xf32, #tpu.memory_space<vmem>>, %arg2: memref<100x256xbf16, #tpu.memory_space<vmem>>, %arg3: memref<1x256xf32, #tpu.memory_space<vmem>>, %arg4: memref<256x256xbf16, #tpu.memory_space<vmem>>, %arg5: memref<1x256xf32, #tpu.memory_space<vmem>>, %arg6: memref<1x256xf32, #tpu.memory_space<vmem>>, %arg7: memref<1xf32, #tpu.memory_space<smem>>, %arg8: memref<32x1xf32, #tpu.memory_space<vmem>>) attributes {dimension_semantics = [#tpu.dimension_semantics<parallel>], iteration_bounds = array<i64: 2>, scalar_prefetch = 0 : i64, scratch_operands = 0 : i64, tpu.core_type = #tpu.core_type<tc>, window_params = [{transform_indices = @transform_0, window_bounds = array<i64: 32, 100>}, {pipeline_mode = #tpu.pipeline_mode<synchronous>, transform_indices = @transform_1, window_bounds = array<i64: 100, 256>}, {pipeline_mode = #tpu.pipeline_mode<synchronous>, transform_indices = @transform_2, window_bounds = array<i64: 1, 256>}, {pipeline_mode = #tpu.pipeline_mode<synchronous>, transform_indices = @transform_3, window_bounds = array<i64: 256, 256>}, {pipeline_mode = #tpu.pipeline_mode<synchronous>, transform_indices = @transform_4, window_bounds = array<i64: 1, 256>}, {pipeline_mode = #tpu.pipeline_mode<synchronous>, transform_indices = @transform_5, window_bounds = array<i64: 1, 256>}, {transform_indices = @transform_6, window_bounds = array<i64: 1>}, {transform_indices = @transform_7, window_bounds = array<i64: 32, 1>}]} {
    %c0 = arith.constant 0 : index
    %c0_0 = arith.constant 0 : index
    %0 = vector.load %arg1[%c0, %c0_0] : memref<32x100xf32, #tpu.memory_space<vmem>>, vector<32x100xf32>
    %1 = arith.truncf %0 : vector<32x100xf32> to vector<32x100xbf16>
    %c0_1 = arith.constant 0 : index
    %c0_2 = arith.constant 0 : index
    %2 = vector.load %arg2[%c0_1, %c0_2] : memref<100x256xbf16, #tpu.memory_space<vmem>>, vector<100x256xbf16>
    %cst = arith.constant dense<0.000000e+00> : vector<32x256xf32>
    %3 = tpu.matmul %1, %2, %cst {dimension_numbers = #tpu.dot_dimension_numbers<[1], [0], [0], [1], [0, 0, 1, 1], [], []>} : vector<32x100xbf16>, vector<100x256xbf16>, vector<32x256xf32> -> vector<32x256xf32>
    %c0_3 = arith.constant 0 : index
    %c0_4 = arith.constant 0 : index
    %4 = vector.load %arg3[%c0_3, %c0_4] : memref<1x256xf32, #tpu.memory_space<vmem>>, vector<1x256xf32>
    %5 = vector.broadcast %4 : vector<1x256xf32> to vector<32x256xf32>
    %6 = arith.addf %3, %5 : vector<32x256xf32>
    %cst_5 = arith.constant 0.000000e+00 : f32
    %7 = vector.broadcast %cst_5 : f32 to vector<32x256xf32>
    %8 = arith.maximumf %6, %7 : vector<32x256xf32>
    %9 = arith.truncf %8 : vector<32x256xf32> to vector<32x256xbf16>
    %c0_6 = arith.constant 0 : index
    %c0_7 = arith.constant 0 : index
    %10 = vector.load %arg4[%c0_6, %c0_7] : memref<256x256xbf16, #tpu.memory_space<vmem>>, vector<256x256xbf16>
    %cst_8 = arith.constant dense<0.000000e+00> : vector<32x256xf32>
    %11 = tpu.matmul %9, %10, %cst_8 {dimension_numbers = #tpu.dot_dimension_numbers<[1], [0], [0], [1], [0, 0, 1, 1], [], []>} : vector<32x256xbf16>, vector<256x256xbf16>, vector<32x256xf32> -> vector<32x256xf32>
    %c0_9 = arith.constant 0 : index
    %c0_10 = arith.constant 0 : index
    %12 = vector.load %arg5[%c0_9, %c0_10] : memref<1x256xf32, #tpu.memory_space<vmem>>, vector<1x256xf32>
    %13 = vector.broadcast %12 : vector<1x256xf32> to vector<32x256xf32>
    %14 = arith.addf %11, %13 : vector<32x256xf32>
    %cst_11 = arith.constant 0.000000e+00 : f32
    %15 = vector.broadcast %cst_11 : f32 to vector<32x256xf32>
    %16 = arith.maximumf %14, %15 : vector<32x256xf32>
    %c0_12 = arith.constant 0 : index
    %c0_13 = arith.constant 0 : index
    %17 = vector.load %arg6[%c0_12, %c0_13] : memref<1x256xf32, #tpu.memory_space<vmem>>, vector<1x256xf32>
    %18 = vector.broadcast %17 : vector<1x256xf32> to vector<32x256xf32>
    %19 = arith.mulf %16, %18 : vector<32x256xf32>
    %cst_14 = arith.constant dense<0.000000e+00> : vector<32xf32>
    %20 = vector.multi_reduction <add>, %19, %cst_14 [1] : vector<32x256xf32> to vector<32xf32>
    %21 = vector.shape_cast %20 : vector<32xf32> to vector<32x1xf32>
    %c0_15 = arith.constant 0 : index
    %22 = memref.load %arg7[%c0_15] : memref<1xf32, #tpu.memory_space<smem>>
    %23 = vector.broadcast %22 : f32 to vector<32x1xf32>
    %24 = arith.addf %21, %23 : vector<32x1xf32>
    %25 = arith.negf %24 : vector<32x1xf32>
    %26 = math.exp %25 : vector<32x1xf32>
    %cst_16 = arith.constant 1.000000e+00 : f32
    %27 = vector.broadcast %cst_16 : f32 to vector<32x1xf32>
    %28 = arith.addf %27, %26 : vector<32x1xf32>
    %29 = arith.divf %27, %28 : vector<32x1xf32>
    %c0_17 = arith.constant 0 : index
    %c0_18 = arith.constant 0 : index
    %30 = vector.load %arg8[%c0_17, %c0_18] : memref<32x1xf32, #tpu.memory_space<vmem>>, vector<32x1xf32>
    tpu.vector_store %arg8[%c0_17, %c0_18], %29 {strides = array<i32>} : memref<32x1xf32, #tpu.memory_space<vmem>>, vector<32x1xf32>,
    return
  }
  func.func @transform_0(%arg0: i32) -> (i32, i32) {
    %c0_i32 = arith.constant 0 : i32
    %c0_i32_0 = arith.constant 0 : i32
    return %arg0, %c0_i32 : i32, i32
  }
  func.func @transform_1(%arg0: i32) -> (i32, i32) {
    %c0_i32 = arith.constant 0 : i32
    %c0_i32_0 = arith.constant 0 : i32
    %c0_i32_1 = arith.constant 0 : i32
    return %c0_i32, %c0_i32_0 : i32, i32
  }
  func.func @transform_2(%arg0: i32) -> (i32, i32) {
    %c0_i32 = arith.constant 0 : i32
    %c0_i32_0 = arith.constant 0 : i32
    %c0_i32_1 = arith.constant 0 : i32
    return %c0_i32, %c0_i32_0 : i32, i32
  }
  func.func @transform_3(%arg0: i32) -> (i32, i32) {
    %c0_i32 = arith.constant 0 : i32
    %c0_i32_0 = arith.constant 0 : i32
    %c0_i32_1 = arith.constant 0 : i32
    return %c0_i32, %c0_i32_0 : i32, i32
  }
  func.func @transform_4(%arg0: i32) -> (i32, i32) {
    %c0_i32 = arith.constant 0 : i32
    %c0_i32_0 = arith.constant 0 : i32
    %c0_i32_1 = arith.constant 0 : i32
    return %c0_i32, %c0_i32_0 : i32, i32
  }
  func.func @transform_5(%arg0: i32) -> (i32, i32) {
    %c0_i32 = arith.constant 0 : i32
    %c0_i32_0 = arith.constant 0 : i32
    %c0_i32_1 = arith.constant 0 : i32
    return %c0_i32, %c0_i32_0 : i32, i32
  }
  func.func @transform_6(%arg0: i32) -> i32 {
    %c0_i32 = arith.constant 0 : i32
    %c0_i32_0 = arith.constant 0 : i32
    return %c0_i32 : i32
  }
  func.func @transform_7(%arg0: i32) -> (i32, i32) {
    %c0_i32 = arith.constant 0 : i32
    %c0_i32_0 = arith.constant 0 : i32
    return %arg0, %c0_i32 : i32, i32
  }
}

</mosaic_0001>

<bundles_post_ra>
// kernel: tpu_custom_call.1
= control target key start
LH: loop header
LB: loop body
LE: loop exit
PB: predicated region body
PF: predicated region fallthrough
CT: control target
= control target key end

     0   :  { %s1896_s0 = inlined_call_operand.hbm [shape: f32[50,100], index: 0, kind: input, shape index: {}]   ;;  %s1897_s1 = inlined_call_operand.hbm [shape: bf16[100,256], index: 1, kind: input, shape index: {}]   ;;  %s1898_s2 = inlined_call_operand.vmem [shape: f32[1,256], index: 2, kind: input, shape index: {}]   ;;  %s1899_s3 = inlined_call_operand.hbm [shape: bf16[256,256], index: 3, kind: input, shape index: {}]   ;;  %s1900_s4 = inlined_call_operand.vmem [shape: f32[1,256], index: 4, kind: input, shape index: {}]   ;;  %s1901_s5 = inlined_call_operand.vmem [shape: f32[1,256], index: 5, kind: input, shape index: {}]   ;;  %s1902_s6 = inlined_call_operand.<no memory space> [shape: f32[1], index: 6, kind: input, shape index: {}]   ;;  %s1903_s7 = inlined_call_operand.vmem [shape: f32[50,1], index: 7, kind: output, shape index: {}]  }
   0x1   :  { %12 = sst [smem:[#allocation2]] %s1902_s6 }
   0x2   :  { %13 = vsyncpa [#allocation4], 0 }
   0x3   :  { %15 = vsyncpa [#allocation4 + $0x1], 0 }
   0x4   :  { %16 = vsyncpa [#allocation6], 0  ;;  %s1641_s26 = smov 0   ;;  %s1643_s27 = smov 0  }
   0x5   :  { %s1645_s28 = smov 0   ;;  %s1647_s29 = smov 0  }
   0x6 LB: > { %s1660_s6 = sadd.s32 4294967295, %s1556_s29   ;;  %s1663_s30 = sadd.s32 1, %s1556_s29   ;;  %s1556_s29 = sphi %s1647_s29, %s1924_s29   ;;  %s1552_s28 = sphi %s1645_s28, %s1923_s28   ;;  %s1548_s27 = sphi %s1643_s27, %s1922_s27   ;;  %s1544_s26 = sphi %s1641_s26, %s1921_s26  }
   0x7   : > { %s26_s8 = ssub.s32 %s1556_s29, %s1663_s30  ;;  %s29_s9 = sadd.s32 1, %s1552_s28 }
   0x8   : > { %p27_p0 = scmp.eq.s32.totalorder %s26_s8, 0  ;;  %p36_p1 = scmp.ne.s32.totalorder %s1552_s28, %s1548_s27 }
   0x9   : > { %p37_p2 = scmp.eq.s32.totalorder %s1556_s29, 0  ;;  %p42_p3 = scmp.ne.s32.totalorder %s1548_s27, %s1544_s26 }
   0xa   : > { %s1673_s10 = scalar_select %p27_p0, %s1552_s28, %s29_s9  }
   0xb   : > { %p1675_p4 = por %p37_p2, %p36_p1  ;;  %p1904_p5 = scmp.eq.s32.totalorder %s1660_s6, 0 }
   0xc   : > { %p192_p6 = scmp.eq.s32.totalorder %s1660_s6, 1  ;;  %p1105_p7 = scmp.ge.s32.totalorder %s1556_s29, 1 }
   0xd   : > { %s1907_s11 = scalar_select %p1675_p4, 1, 0 }
   0xe   : > { %p1684_p8 = por %p1904_p5, %p42_p3  ;;  %p205_p9 = scmp.lt.s32.totalorder %s1556_s29, 3 }
   0xf   : > { %p1689_p10 = por %p192_p6, %p36_p1  ;;  %s1590_s15 = smov [#allocation5]  }
  0x10   : > { %s1908_s12 = scalar_select %p1684_p8, 1, 0 }
  0x11   : > { %s1909_s13 = scalar_select %p1689_p10, 1, 0 }
  0x12   : > { %p1693_p11 = pnand %p1105_p7, %p205_p9  ;;  %s217_s16 = sshll.u32 %s1590_s15, 4  ;;  %s218_s16 = int_to_ptr.vmem [resolvable:$true] %s217_s16 }
  0x13   : > { %s1591_s18 = smov [#allocation7]   ;;  %s1402_s22 = scalar_lea.hbm %s1897_s1, 1664 }
  0x14   : > { %s1910_s14 = scalar_select %p1693_p11, 1, 0 }
  0x15   : > { %p1204_p12 = pneg %p1693_p11  ;;  %s233_s19 = sshll.u32 %s1591_s18, 4  ;;  %s1705_s19 = int_to_ptr.vmem [resolvable:$true] %s233_s19 }
  0x16   : > { %p1403_p0 = scmp.ne.s32.totalorder %s1897_s1, %s1402_s22  ;;  %p1409_p6 = scmp.lt.u32.totalorder %s1402_s22, %s1897_s1 }
  0x17   : > { %p1701_p13 = pnand %p1204_p12, %p1904_p5 }
  0x19   : > { %p1404_p1 = pneg %p1701_p13 }
  0x1b   : > { %p1405_p2 = pnand %p1404_p1, %p1403_p0 }
  0x1d   : > { %p1406_p3 = pneg %p1405_p2 }
  0x1f   : > { %p1411_p7 = pnand %p1409_p6, %p1406_p3 }
  0x21   : > { %1414 = shalt.err (!%p1411_p7)
}
  0x22   : > { %s1415_s8 = scalar_lea.vmem %s218_s16, 1664  ;;  %p1423_p10 = scmp.lt.s32.totalorder %s218_s16, %s218_s16 }
  0x23   : > { %p1416_p9 = scmp.ne.s32.totalorder %s218_s16, %s1415_s8  ;;  %p1424_p8 = scmp.lt.s32.totalorder %s1415_s8, %s1415_s8 }
  0x25   : > { %p1418_p12 = pnand %p1416_p9, %p1404_p1  ;;  %p1425_p11 = por %p1424_p8, %p1423_p10 }
  0x27   : > { %p1419_p5 = pneg %p1418_p12 }
  0x29   : > { %p1426_p4 = pnand %p1425_p11, %p1419_p5 }
  0x2b   : > { %1429 = shalt.err (!%p1426_p4)
}
  0x2c   : > { %s1592_s9 = smov 128   ;;  %s1593_s15 = smov 8  }
  0x2d   : > { %1207 = dma.hbm_to_vmem [thread:$0]  (!%p1701_p13), %s1897_s1, 1664, %s218_s16, [#allocation6], %s1592_s9, %s1592_s9, %s1593_s15  }
  0x2e   : > { %s1430_s23 = scalar_lea.hbm %s1899_s3, 4096 }
  0x2f   : > { %p1431_p0 = scmp.ne.s32.totalorder %s1899_s3, %s1430_s23  ;;  %p1437_p8 = scmp.lt.u32.totalorder %s1430_s23, %s1899_s3 }
  0x31   : > { %p1433_p4 = pnand %p1431_p0, %p1404_p1 }
  0x33   : > { %p1434_p5 = pneg %p1433_p4 }
  0x35   : > { %p1439_p10 = pnand %p1437_p8, %p1434_p5 }
  0x37   : > { %1442 = shalt.err (!%p1439_p10)
}
  0x38   : > { %s1443_s16 = scalar_lea.vmem %s1705_s19, 4096  ;;  %p1451_p6 = scmp.lt.s32.totalorder %s1705_s19, %s1705_s19 }
  0x39   : > { %p1444_p11 = scmp.ne.s32.totalorder %s1705_s19, %s1443_s16  ;;  %p1452_p7 = scmp.lt.s32.totalorder %s1443_s16, %s1443_s16 }
  0x3b   : > { %p1446_p2 = pnand %p1444_p11, %p1404_p1  ;;  %p1453_p9 = por %p1452_p7, %p1451_p6 }
  0x3d   : > { %p1447_p3 = pneg %p1446_p2 }
  0x3f   : > { %p1454_p12 = pnand %p1453_p9, %p1447_p3 }
  0x41   : > { %1457 = shalt.err (!%p1454_p12)
}
  0x42   : > { %1210 = dma.hbm_to_vmem [thread:$0]  (!%p1701_p13), %s1899_s3, 4096, %s1705_s19, [#allocation6], %s1592_s9, %s1592_s9, %s1593_s15  }
  0x43   : > { %p1108_p0 = scmp.ge.s32.totalorder %s1556_s29, 2 }
  0x44   : > { %p1912_p4 = scmp.ne.s32.totalorder (!%p1108_p0), %s1907_s11, 0 }
  0x45   : > { %252 = sbr.rel (%p1108_p0) target bundleno = 111 (0x6f), region = 40 }
  0x4c   : > { %255 = sbr.rel (!%p1912_p4) target bundleno = 111 (0x6f), region = 44  ;;  %s256_s21 = sand.u32 (%p1912_p4), 1, %s1552_s28  }
  0x4d   : > { %s1110_s22 = sshll.u32 (%p1912_p4), %s1556_s29, 2  ;;  %s1109_s23 = sshll.u32 (%p1912_p4), %s256_s21, 5 }
  0x4e   : > { %s262_s24 = ssub.s32 (%p1912_p4), 7, %s1110_s22  ;;  %s1762_s26 = scalar_lea.sflag (%p1912_p4), [#allocation4], %s256_s21 }
  0x4f   : > { %p263_p1 = scmp.lt.s32.totalorder (%p1912_p4), %s262_s24, 4  ;;  %s260_s19 = scalar_lea.vmem (%p1912_p4), [#allocation3], %s1109_s23 }
  0x53   : > { %s1926_s24 = smov (!%p263_p1, %s262_s24), 4 }
  0x54   : > { %s1759_s17 = sshll.u32 %s1926_s24, 7 }
  0x55   : > { %s267_s25 = ssub.s32 512, %s1759_s17 }
  0x56   : > { %268 = vsyncadd %s1762_s26, %s267_s25  ;;  %p1112_p13 = scmp.ne.s32.totalorder %s1759_s17, 0  ;;  %s1191_s11 = sshll.u32 %s1556_s29, 9 }
  0x57   : > { %s1770_s8 = scalar_lea.hbm %s1896_s0, %s1191_s11  ;;  %s273_s16 = sshll.u32 %s260_s19, 4  ;;  %s1772_s16 = int_to_ptr.vmem [resolvable:$true] %s273_s16 }
  0x58   : > { %s1458_s18 = scalar_lea.hbm %s1770_s8, %s1759_s17  ;;  %s1462_s29 = scalar_lea.hbm %s1896_s0, 896 }
  0x59   : > { %p1459_p5 = scmp.ne.s32.totalorder %s1770_s8, %s1458_s18  ;;  %p1463_p11 = scmp.lt.u32.totalorder %s1770_s8, %s1896_s0 }
  0x5a   : > { %p1464_p2 = scmp.lt.u32.totalorder %s1462_s29, %s1458_s18  ;;  %p1466_p6 = scmp.lt.u32.totalorder %s1458_s18, %s1770_s8 }
  0x5b   : > { %p1460_p8 = pnand %p1459_p5, %p1112_p13 }
  0x5c   : > { %p1465_p3 = por %p1464_p2, %p1463_p11 }
  0x5d   : > { %p1461_p10 = pneg %p1460_p8 }
  0x5e   : > { %p1467_p7 = por %p1466_p6, %p1465_p3 }
  0x60   : > { %p1468_p9 = pnand %p1467_p7, %p1461_p10 }
  0x62   : > { %1471 = shalt.err (!%p1468_p9)
}
  0x63   : > { %s1472_s24 = scalar_lea.vmem %s1772_s16, %s1759_s17  ;;  %s1594_s25 = smov [#allocation3]  }
  0x64   : > { %p1473_p12 = scmp.ne.s32.totalorder %s1772_s16, %s1472_s24  ;;  %s1476_s19 = sshll.u32 %s1594_s25, 4  ;;  %s1477_s19 = int_to_ptr.vmem [resolvable:$false] %s1476_s19 }
  0x65   : > { %s1478_s11 = scalar_lea.vmem %s1477_s19, 1024  ;;  %p1479_p1 = scmp.lt.s32.totalorder %s1772_s16, %s1477_s19 }
  0x66   : > { %p1474_p0 = pnand %p1473_p12, %p1112_p13  ;;  %p1480_p5 = scmp.lt.s32.totalorder %s1478_s11, %s1472_s24 }
  0x68   : > { %p1475_p4 = pneg %p1474_p0  ;;  %p1481_p8 = por %p1480_p5, %p1479_p1 }
  0x6a   : > { %p1482_p11 = pnand %p1481_p8, %p1475_p4 }
  0x6c   : > { %1485 = shalt.err (!%p1482_p11)
}
  0x6d   : > { %s1595_s9 = smov 128   ;;  %s1596_s15 = smov 8  }
  0x6e   : > { %279 = dma.hbm_to_vmem [thread:$0]  (%p1112_p13), %s1770_s8, %s1759_s17, %s1772_s16, %s1762_s26, %s1595_s9, %s1595_s9, %s1596_s15  }
  0x6f PF: > { %p1913_p10 = scmp.ne.s32.totalorder %s1910_s14, 0 }
  0x70   : > { %s287_s18 = sand.u32 (!%p1913_p10), 1, %s1548_s27   ;;  %p1914_p2 = scmp.ne.s32.totalorder (!%p1913_p10), %s1908_s12, 0 }
  0x71   : > { %285 = sbr.rel (%p1913_p10) target bundleno = 828 (0x33c), region = 48  ;;  %s1802_s20 = sshll.u32 (!%p1913_p10), %s287_s18, 5 }
  0x72   : > { %s288_s21 = scalar_lea.sflag (!%p1913_p10), [#allocation4], %s287_s18  ;;  %s1805_s29 = scalar_lea.vmem (!%p1913_p10), [#allocation3], %s1802_s20 }
  0x78   : > { %1535 = dma.done.wait (%p1914_p2), %s288_s21, 512  }
  0x79   : > { %1537 = vsyncadd (%p1914_p2), %s288_s21, 4294966784  ;;  %p1915_p13 = scmp.eq.s32.totalorder %s1660_s6, 0 }
  0x7b   : > { %1539 = dma.done.wait (%p1915_p13), [#allocation6], 5760   ;;  %p1916_p3 = pmov %p1915_p13 }
  0x7c   : > { %v1597_v0 = vmov 0   ;;  %v1318_v1 = vld [vmem:[#allocation5 + $0x4] ss:$8 sps:$4 sm:$0xff]   ;;  %v1320_v2 = vld [vmem:[#allocation5] ss:$8 sps:$4 sm:$0xff]   ;;  %vm443_vm0 = vcmask 1041408   ;;  %v361_v55 = vlaneseq }
  0x7d   : > { %1541 = vsyncadd (%p1916_p3), [#allocation6], 4294961536  ;;  %482 = vmatprep.mubr.bf16.mxu0 %v1597_v0  ;;  %450 = vmatprep.subr.bf16.mxu0 %v1318_v1  ;;  %v1321_v3 = vld [vmem:[#allocation5 + $0x14] ss:$8 sps:$4 sm:$0xff]   ;;  %v1323_v4 = vld [vmem:[#allocation5 + $0x10] ss:$8 sps:$4 sm:$0xff]  }
  0x7e   : > { %451 = vmatpush1.bf16.msra.mxu0 %v1320_v2  ;;  %v1324_v5 = vld [vmem:[#allocation5 + $0x24] ss:$8 sps:$4 sm:$0xff]   ;;  %v1326_v6 = vld [vmem:[#allocation5 + $0x20] ss:$8 sps:$4 sm:$0xff]   ;;  %v1327_v7 = vld [vmem:[#allocation5 + $0x34] ss:$8 sps:$4 sm:$0xff]  }
  0x7f   : > { %452 = vmatprep.subr.bf16.mxu0 %v1321_v3  ;;  %v1329_v8 = vld [vmem:[#allocation5 + $0x30] ss:$8 sps:$4 sm:$0xff]   ;;  %v1338_v9 = vld [vmem:[#allocation7 + $0x4] ss:$8 sps:$4 sm:$0xff]   ;;  %v1341_v11 = vld [vmem:[#allocation7 + $0x14] ss:$8 sps:$4 sm:$0xff]  }
  0x80   : > { %v1340_v10 = vld [vmem:[#allocation7] ss:$8 sps:$4 sm:$0xff]   ;;  %v1330_v12 = vld [vmem:[#allocation5 + $0x44] ss:$8 sps:$4 sm:$0xff]   ;;  %719 = vmatprep.subr.bf16.mxu1 %v1338_v9  ;;  %v1343_v13 = vld [vmem:[#allocation7 + $0x10] ss:$8 sps:$4 sm:$0xff]  }
  0x81   : > { %720 = vmatpush1.bf16.msra.mxu1 %v1340_v10  ;;  %v1344_v14 = vld [vmem:[#allocation7 + $0x24] ss:$8 sps:$4 sm:$0xff]   ;;  %v1332_v15 = vld [vmem:[#allocation5 + $0x40] ss:$8 sps:$4 sm:$0xff]   ;;  %v1347_v19 = vld [vmem:[#allocation7 + $0x34] ss:$8 sps:$4 sm:$0xff]  }
  0x82   : > { %453 = vmatpush1.bf16.msra.mxu0 %v1323_v4  ;;  %721 = vmatprep.subr.bf16.mxu1 %v1341_v11  ;;  %v1333_v16 = vld [vmem:[#allocation5 + $0x54] ss:$8 sps:$4 sm:$0xff]   ;;  %v358_v17 = vld [vmem:[#allocation5 + $0x60] sm:$0x33]  ;;  %v1346_v18 = vld [vmem:[#allocation7 + $0x20] ss:$8 sps:$4 sm:$0xff]  }
  0x83   : > { %454 = vmatprep.subr.bf16.mxu0 %v1324_v5  ;;  %v1335_v20 = vld [vmem:[#allocation5 + $0x50] ss:$8 sps:$4 sm:$0xff]   ;;  %v1134_v21 = vcombine.high %v358_v17, %v358_v17  ;;  %v1133_v22 = vcombine.low %v358_v17, %v358_v17  ;;  %v340_v24 = vld [vmem:[%s1805_s29] sm:$0xff]  ;;  %v1350_v25 = vld [vmem:[#allocation7 + $0x44] ss:$8 sps:$4 sm:$0xff]   ;;  %vm436_vm1 = vcmask 818176  }
  0x84   : > { %v1349_v23 = vld [vmem:[#allocation7 + $0x30] ss:$8 sps:$4 sm:$0xff]   ;;  %v341_v26 = vld [vmem:[%s1805_s29 + $0x8] sm:$0xff]  ;;  %v1353_v30 = vld [vmem:[#allocation7 + $0x54] ss:$8 sps:$4 sm:$0xff]   ;;  %v362_v56 = vshrl.u32 %v361_v55, 7 }
  0x85   : > { %722 = vmatpush1.bf16.msra.mxu1 %v1343_v13  ;;  %v445_v27 = vsel %vm443_vm0, %v1133_v22, 0  ;;  %v1352_v28 = vld [vmem:[#allocation7 + $0x40] ss:$8 sps:$4 sm:$0xff]   ;;  %v344_v29 = vpack.c.bf16 %v341_v26, %v340_v24  ;;  %v1355_v31 = vld [vmem:[#allocation7 + $0x50] ss:$8 sps:$4 sm:$0xff]   ;;  %s812_s22 = sld [smem:[#allocation2]] }
  0x86   : > { %455 = vmatpush1.bf16.msra.mxu0 %v1326_v6  ;;  %723 = vmatprep.subr.bf16.mxu1 %v1344_v14  ;;  %v1356_v32 = vld [vmem:[#allocation7 + $0x64] ss:$8 sps:$4 sm:$0xff]   ;;  %v343_v34 = vld [vmem:[%s1805_s29 + $0x18] sm:$0xff]  ;;  %v1358_v35 = vld [vmem:[#allocation7 + $0x60] ss:$8 sps:$4 sm:$0xff]   ;;  %v363_v57 = vsub.s32 0, %v362_v56 }
  0x87   : > { %456 = vmatprep.subr.bf16.mxu0 %v1327_v7  ;;  %v342_v33 = vld [vmem:[%s1805_s29 + $0x10] sm:$0xff]  ;;  %v1359_v37 = vld [vmem:[#allocation7 + $0x74] ss:$8 sps:$4 sm:$0xff]   ;;  %v1361_v38 = vld [vmem:[#allocation7 + $0x70] ss:$8 sps:$4 sm:$0xff]   ;;  %v367_v59 = vsub.s32 1, %v362_v56 }
  0x88   : > { %v345_v36 = vpack.c.bf16 %v343_v34, %v342_v33  ;;  %v1362_v39 = vld [vmem:[#allocation7 + $0x84] ss:$8 sps:$4 sm:$0xff]   ;;  %v1364_v40 = vld [vmem:[#allocation7 + $0x80] ss:$8 sps:$4 sm:$0xff]   ;;  %v1365_v41 = vld [vmem:[#allocation7 + $0x94] ss:$8 sps:$4 sm:$0xff]  }
  0x89   : > { %724 = vmatpush1.bf16.msra.mxu1 %v1346_v18  ;;  %v1367_v42 = vld [vmem:[#allocation7 + $0x90] ss:$8 sps:$4 sm:$0xff]   ;;  %v1368_v43 = vld [vmem:[#allocation7 + $0xa4] ss:$8 sps:$4 sm:$0xff]   ;;  %v1370_v44 = vld [vmem:[#allocation7 + $0xa0] ss:$8 sps:$4 sm:$0xff]  }
  0x8a   : > { %457 = vmatpush1.bf16.msra.mxu0 %v1329_v8  ;;  %725 = vmatprep.subr.bf16.mxu1 %v1347_v19  ;;  %v1371_v45 = vld [vmem:[#allocation7 + $0xb4] ss:$8 sps:$4 sm:$0xff]   ;;  %v1373_v46 = vld [vmem:[#allocation7 + $0xb0] ss:$8 sps:$4 sm:$0xff]   ;;  %v1374_v47 = vld [vmem:[#allocation7 + $0xc4] ss:$8 sps:$4 sm:$0xff]  }
  0x8b   : > { %458 = vmatprep.subr.bf16.mxu0 %v1330_v12  ;;  %v1376_v48 = vld [vmem:[#allocation7 + $0xc0] ss:$8 sps:$4 sm:$0xff]   ;;  %v1377_v49 = vld [vmem:[#allocation7 + $0xd4] ss:$8 sps:$4 sm:$0xff]   ;;  %v1379_v50 = vld [vmem:[#allocation7 + $0xd0] ss:$8 sps:$4 sm:$0xff]  }
  0x8c   : > { %v1380_v51 = vld [vmem:[#allocation7 + $0xe4] ss:$8 sps:$4 sm:$0xff]   ;;  %v1382_v52 = vld [vmem:[#allocation7 + $0xe0] ss:$8 sps:$4 sm:$0xff]   ;;  %v1383_v53 = vld [vmem:[#allocation7 + $0xf4] ss:$8 sps:$4 sm:$0xff]  }
  0x8d   : > { %726 = vmatpush1.bf16.msra.mxu1 %v1349_v23  ;;  %v1385_v54 = vld [vmem:[#allocation7 + $0xf0] ss:$8 sps:$4 sm:$0xff]   ;;  %vm842_vm2 = vcmask 7168   ;;  %s1831_s23 = scalar_lea.vmem [#allocation8], %s1802_s20   ;;  %p1917_p6 = scmp.ne.s32.totalorder %s1909_s13, 0 }
  0x8e   : > { %459 = vmatpush1.bf16.msra.mxu0 %v1332_v15  ;;  %727 = vmatprep.subr.bf16.mxu1 %v1350_v25  ;;  %v359_v58 = vld [vmem:[%s1898_s2] sm:$0x3]  ;;  %s1175_s24 = sshll.u32 (%p1917_p6), %s1660_s6, 2  ;;  %s1192_s25 = sshll.u32 (%p1917_p6), %s1660_s6, 5 }
  0x8f   : > { %460 = vmatprep.subr.bf16.mxu0 %v1333_v16  ;;  %v364_v60 = vrot.slane %v359_v58, %v363_v57  ;;  %v368_v61 = vrot.slane %v359_v58, %v367_v59  ;;  %v547_v26 = vld [vmem:[%s1900_s4] sm:$0x3]  ;;  %s855_s19 = ssub.s32 (%p1917_p6), 7, %s1175_s24  ;;  %s1844_s15 = scalar_lea.vmem (%p1917_p6), %s1903_s7, %s1192_s25  }
  0x90   : > { %p856_p7 = scmp.lt.s32.totalorder (%p1917_p6), %s855_s19, 4 }
  0x91   : > { %728 = vmatpush1.bf16.msra.mxu1 %v1352_v28  ;;  %v556_v28 = vrot.slane %v547_v26, %v367_v59 }
  0x92   : > { %461 = vmatpush1.bf16.msra.mxu0 %v1335_v20  ;;  %729 = vmatprep.subr.bf16.mxu1 %v1353_v30 }
  0x93   : > { %1135 = vmatprep.subr.msk.bf16.mxu0 %vm443_vm0, %v1134_v21 }
  0x95   : > { %730 = vmatpush1.bf16.msra.mxu1 %v1355_v31 }
  0x96   : > { %463 = vmatpush1.bf16.msra.mxu0 %v445_v27  ;;  %731 = vmatprep.subr.bf16.mxu1 %v1356_v32  ;;  %v552_v27 = vrot.slane %v547_v26, %v363_v57 }
  0x99   : > { %1136 = vmatmul.mubr.msk.bf16.vlgmr.msra.gmra.mrb[0].mxu0 %vm436_vm1, %v344_v29  ;;  %732 = vmatpush1.bf16.msra.mxu1 %v1358_v35  ;;  %v780_v29 = vld [vmem:[%s1901_s5] sm:$0x3] }
  0x9a   : > { %492 = vmatprep.mubr.bf16.mxu0 %v1597_v0  ;;  %733 = vmatprep.subr.bf16.mxu1 %v1359_v37  ;;  %v785_v33 = vrot.slane %v780_v29, %v363_v57 }
  0x9d   : > { %734 = vmatpush1.bf16.msra.mxu1 %v1361_v38 }
  0x9e   : > { %735 = vmatprep.subr.bf16.mxu1 %v1362_v39 }
  0xa1   : > { %1137 = vmatmul.mubr.msk.bf16.gmra.mrb[4].mxu0 %vm436_vm1, %v345_v36  ;;  %736 = vmatpush1.bf16.msra.mxu1 %v1364_v40  ;;  %v789_v36 = vrot.slane %v780_v29, %v367_v59 }
  0xa2   : > { %737 = vmatprep.subr.bf16.mxu1 %v1365_v41 }
  0xa5   : > { %738 = vmatpush1.bf16.msra.mxu1 %v1367_v42 }
  0xa6   : > { %739 = vmatprep.subr.bf16.mxu1 %v1368_v43 }
  0xa9   : > { %740 = vmatpush1.bf16.msra.mxu1 %v1370_v44 }
  0xaa   : > { %741 = vmatprep.subr.bf16.mxu1 %v1371_v45 }
  0xad   : > { %742 = vmatpush1.bf16.msra.mxu1 %v1373_v46 }
  0xae   : > { %743 = vmatprep.subr.bf16.mxu1 %v1374_v47 }
  0xb1   : > { %744 = vmatpush1.bf16.msra.mxu1 %v1376_v48 }
  0xb2   : > { %745 = vmatprep.subr.bf16.mxu1 %v1377_v49 }
  0xb5   : > { %746 = vmatpush1.bf16.msra.mxu1 %v1379_v50 }
  0xb6   : > { %747 = vmatprep.subr.bf16.mxu1 %v1380_v51 }
  0xb9   : > { %748 = vmatpush1.bf16.msra.mxu1 %v1382_v52 }
  0xba   : > { %749 = vmatprep.subr.bf16.mxu1 %v1383_v53 }
  0xbd   : > { %750 = vmatpush1.bf16.msra.mxu1 %v1385_v54 }
 0x16c   : > { %v484_v62 = vpop.f32.mrb[0].mxu0 }
 0x16d   : > { %v485_v63 = vadd.f32 %v484_v62, %v364_v60  ;;  %v486_v0 = vpop.f32.mrb[1].mxu0 }
 0x16e   : > { %v487_v1 = vadd.f32 %v486_v0, %v368_v61  ;;  %v488_v2 = vpop.f32.mrb[2].mxu0 }
 0x16f   : > { %v489_v3 = vadd.f32 %v488_v2, %v364_v60  ;;  %v490_v4 = vpop.f32.mrb[3].mxu0  ;;  %v503_v6 = vmax.f32 %v485_v63, 0.0 }
 0x170   : > { %v491_v5 = vadd.f32 %v490_v4, %v368_v61  ;;  %v504_v8 = vmax.f32 %v487_v1, 0.0  ;;  %v813_v4 = vstv %s812_s22 }
 0x171   : > { %v505_v7 = vmax.f32 %v489_v3, 0.0 }
 0x172   : > { %v506_v9 = vmax.f32 %v491_v5, 0.0 }
 0x173   : > { %v511_v10 = vpack.c.bf16 %v505_v7, %v503_v6 }
 0x174   : > { %v494_v11 = vpop.f32.mrb[4].mxu0  ;;  %v512_v12 = vpack.c.bf16 %v506_v9, %v504_v8 }
 0x175   : > { %v495_v13 = vadd.f32 %v494_v11, %v364_v60  ;;  %v496_v14 = vpop.f32.mrb[5].mxu0 }
 0x176   : > { %v497_v15 = vadd.f32 %v496_v14, %v368_v61  ;;  %v498_v16 = vpop.f32.mrb[6].mxu0  ;;  %751 = vmatprep.mubr.bf16.mxu1 %v512_v12 }
 0x177   : > { %v499_v17 = vadd.f32 %v498_v16, %v364_v60  ;;  %v500_v18 = vpop.f32.mrb[7].mxu0  ;;  %752 = vmatmul.mubr.bf16.vlgmr.msra.gmra.mrb[0].mxu1 %v511_v10  ;;  %v507_v20 = vmax.f32 %v495_v13, 0.0 }
 0x178   : > { %v501_v19 = vadd.f32 %v500_v18, %v368_v61  ;;  %v508_v22 = vmax.f32 %v497_v15, 0.0 }
 0x179   : > { %v509_v21 = vmax.f32 %v499_v17, 0.0 }
 0x17a   : > { %v510_v23 = vmax.f32 %v501_v19, 0.0 }
 0x17b   : > { %v513_v24 = vpack.c.bf16 %v509_v21, %v507_v20 }
 0x17c   : > { %v514_v25 = vpack.c.bf16 %v510_v23, %v508_v22 }
 0x17e   : > { %761 = vmatprep.mubr.bf16.mxu1 %v514_v25 }
 0x17f   : > { %762 = vmatmul.mubr.bf16.gmra.mrb[4].mxu1 %v513_v24 }
 0x24a   : > { %v753_v30 = vpop.f32.mrb[0].mxu1 }
 0x24b   : > { %v754_v31 = vadd.f32 %v753_v30, %v552_v27  ;;  %v755_v32 = vpop.f32.mrb[1].mxu1 }
 0x24c   : > { %v756_v34 = vadd.f32 %v755_v32, %v556_v28  ;;  %v757_v35 = vpop.f32.mrb[2].mxu1 }
 0x24d   : > { %v772_v37 = vmax.f32 %v754_v31, 0.0  ;;  %v758_v38 = vadd.f32 %v757_v35, %v552_v27  ;;  %v759_v39 = vpop.f32.mrb[3].mxu1 }
 0x24e   : > { %v773_v40 = vmax.f32 %v756_v34, 0.0  ;;  %v760_v41 = vadd.f32 %v759_v39, %v556_v28 }
 0x24f   : > { %v774_v42 = vmax.f32 %v758_v38, 0.0  ;;  %v792_v43 = vmul.f32 %v785_v33, %v772_v37 }
 0x250   : > { %v775_v44 = vmax.f32 %v760_v41, 0.0  ;;  %v793_v45 = vmul.f32 %v789_v36, %v773_v40 }
 0x251   : > { %v794_v46 = vmul.f32 %v785_v33, %v774_v42 }
 0x252   : > { %v795_v47 = vmul.f32 %v789_v36, %v775_v44  ;;  %v763_v48 = vpop.f32.mrb[4].mxu1  ;;  %v800_v49 = vadd.f32 %v793_v45, %v792_v43 }
 0x253   : > { %v764_v50 = vadd.f32 %v763_v48, %v552_v27  ;;  %v765_v51 = vpop.f32.mrb[5].mxu1 }
 0x254   : > { %v766_v52 = vadd.f32 %v765_v51, %v556_v28  ;;  %v767_v53 = vpop.f32.mrb[6].mxu1  ;;  %801 = vadd.xlane.f32.xlu0 %v800_v49  ;;  %v803_v54 = vadd.f32 %v795_v47, %v794_v46 }
 0x255   : > { %v776_v55 = vmax.f32 %v764_v50, 0.0  ;;  %v768_v56 = vadd.f32 %v767_v53, %v552_v27  ;;  %v769_v57 = vpop.f32.mrb[7].mxu1 }
 0x256   : > { %v777_v58 = vmax.f32 %v766_v52, 0.0  ;;  %v770_v59 = vadd.f32 %v769_v57, %v556_v28 }
 0x257   : > { %v778_v60 = vmax.f32 %v768_v56, 0.0  ;;  %v796_v61 = vmul.f32 %v785_v33, %v776_v55 }
 0x258   : > { %v779_v62 = vmax.f32 %v770_v59, 0.0  ;;  %804 = vadd.xlane.f32.xlu0 %v803_v54  ;;  %v797_v63 = vmul.f32 %v789_v36, %v777_v58 }
 0x259   : > { %v798_v0 = vmul.f32 %v785_v33, %v778_v60 }
 0x25a   : > { %v799_v1 = vmul.f32 %v789_v36, %v779_v62  ;;  %v806_v2 = vadd.f32 %v797_v63, %v796_v61 }
 0x25c   : > { %807 = vadd.xlane.f32.xlu1 %v806_v2  ;;  %v809_v3 = vadd.f32 %v799_v1, %v798_v0 }
 0x260   : > { %810 = vadd.xlane.f32.xlu1 %v809_v3 }
 0x2e1   : > { %v802_v5 = vpop.xlane.xlu0 %801 }
 0x2e2   : > { %v814_v6 = vadd.f32 %v813_v4, %v802_v5 }
 0x2e4   : > { %v1170_v7 = vmul.f32 -1.442695, %v814_v6 }
 0x2e5   : > { %v805_v8 = vpop.xlane.xlu0 %804 }
 0x2e6   : > { %1386 = vpow2.f32 %v1170_v7  ;;  %v815_v9 = vadd.f32 %v813_v4, %v805_v8 }
 0x2e8   : > { %v1171_v10 = vmul.f32 -1.442695, %v815_v9 }
 0x2e9   : > { %v808_v11 = vpop.xlane.xlu1 %807 }
 0x2ea   : > { %1388 = vpow2.f32 %v1171_v10  ;;  %v816_v12 = vadd.f32 %v813_v4, %v808_v11 }
 0x2ec   : > { %v1172_v13 = vmul.f32 -1.442695, %v816_v12 }
 0x2ed   : > { %v811_v14 = vpop.xlane.xlu1 %810 }
 0x2ee   : > { %1390 = vpow2.f32 %v1172_v13  ;;  %v817_v15 = vadd.f32 %v813_v4, %v811_v14 }
 0x2f0   : > { %v1387_v16 = vpop.eup %1386  ;;  %v1173_v17 = vmul.f32 -1.442695, %v817_v15 }
 0x2f1   : > { %v830_v18 = vadd.f32 1.0, %v1387_v16 }
 0x2f2   : > { %1392 = vpow2.f32 %v1173_v17 }
 0x2f3   : > { %1394 = vrcp.f32 %v830_v18 }
 0x2f4   : > { %v1389_v19 = vpop.eup %1388 }
 0x2f5   : > { %v831_v20 = vadd.f32 1.0, %v1389_v19 }
 0x2f7   : > { %1396 = vrcp.f32 %v831_v20 }
 0x2f8   : > { %v1391_v21 = vpop.eup %1390 }
 0x2f9   : > { %v832_v22 = vadd.f32 1.0, %v1391_v21 }
 0x2fb   : > { %1398 = vrcp.f32 %v832_v22 }
 0x2fc   : > { %v1393_v23 = vpop.eup %1392 }
 0x2fd   : > { %v1395_v24 = vpop.eup %1394  ;;  %v833_v25 = vadd.f32 1.0, %v1393_v23 }
 0x2fe   : > { %843 = vst.msk [vmem:[%s1831_s23] sm:$0xff] %vm842_vm2, %v1395_v24 }
 0x2ff   : > { %1400 = vrcp.f32 %v833_v25 }
 0x301   : > { %v1397_v26 = vpop.eup %1396 }
 0x302   : > { %844 = vst.msk [vmem:[%s1831_s23 + $0x8] sm:$0xff] %vm842_vm2, %v1397_v26 }
 0x304   : > { %853 = sbr.rel (!%p1917_p6) target bundleno = 828 (0x33c), region = 64 }
 0x305   : > { %v1399_v27 = vpop.eup %1398 }
 0x306   : > { %845 = vst.msk [vmem:[%s1831_s23 + $0x10] sm:$0xff] %vm842_vm2, %v1399_v27 }
 0x309   : > { %v1401_v28 = vpop.eup %1400 }
 0x30a   : > { %846 = vst.msk [vmem:[%s1831_s23 + $0x18] sm:$0xff] %vm842_vm2, %v1401_v28 }
 0x30b   : > { %s1928_s19 = smov (!%p856_p7, %s855_s19), 4 }
 0x30c   : > { %s1176_s18 = sshll.u32 %s1928_s19, 7 }
 0x30d   : > { %p1179_p9 = scmp.eq.s32.totalorder %s1176_s18, 0 }
 0x30e   : > { %s1850_s13 = sshrl.u32 (!%p1179_p9), %s1928_s19, 2 }
 0x30f   : > { %864 = sbr.rel (%p1179_p9) target bundleno = 828 (0x33c), region = 68  ;;  %p1180_p12 = scmp.le.s32.totalorder (!%p1179_p9), %s1850_s13, 0 }
 0x316   : > { %1039 = sbr.rel (%p1180_p12) target bundleno = 807 (0x327), region = 150  ;;  %s1918_s6 = smov (!%p1180_p12), %s1844_s15 }
 0x317   : > { %s1919_s20 = smov (!%p1180_p12), %s1831_s23  ;;  %s1859_s21 = smov (!%p1180_p12), 0  }
 0x318   : > { %s1570_s29 = smov (!%p1180_p12), 0  }
 0x31d LB: >> { %v932_v29 = vld [vmem:[%s1564_s20] sm:$0xff]  ;;  %v934_v30 = vld [vmem:[%s1564_s20 + $0x8] sm:$0xff]  ;;  %v936_v31 = vld [vmem:[%s1564_s20 + $0x10] sm:$0xff]  ;;  %s940_s12 = sadd.s32 1, %s1568_s21  ;;  %s926_s29 = sadd.s32 1, %s1572_s29   ;;  %s1572_s29 = sphi %s1570_s29, %s926_s29   ;;  %s1568_s21 = sphi %s1859_s21, %s1920_s21   ;;  %s1564_s20 = sphi %s1919_s20, %s945_s20   ;;  %s1560_s6 = sphi %s1918_s6, %s946_s6  }
 0x31e   : >> { %933 = vst [vmem:[%s1560_s6] sm:$0xff] %v932_v29  ;;  %935 = vst [vmem:[%s1560_s6 + $0x8] sm:$0xff] %v934_v30  ;;  %v938_v32 = vld [vmem:[%s1564_s20 + $0x18] sm:$0xff]  ;;  %p941_p0 = scmp.ge.s32.totalorder %s940_s12, %s1850_s13  ;;  %p925_p4 = scmp.ge.s32.totalorder %s926_s29, %s1850_s13 }
 0x31f   : >> { %937 = vst [vmem:[%s1560_s6 + $0x10] sm:$0xff] %v936_v31  ;;  %939 = vst [vmem:[%s1560_s6 + $0x18] sm:$0xff] %v938_v32 }
 0x320   : >> { %s1930_s12 = smov (%p941_p0, %s940_s12), 0  ;;  %928 = sbr.rel (!%p925_p4) target bundleno = 797 (0x31d), region = 156 }
 0x321   : >> { %s1181_s14 = sshll.u32 %s1930_s12, 5  ;;  %s1920_s21 = smov %s1930_s12 }
 0x322   : >> { %s945_s20 = scalar_lea.vmem %s1831_s23, %s1181_s14 [#allocation8]   ;;  %s946_s6 = scalar_lea.vmem %s1844_s15, %s1181_s14  }
 0x327 PF: > { %s1875_s17 = sand.u32 3, %s1928_s19   ;;  %s1193_s26 = sshll.u32 %s1850_s13, 5 }
 0x328   : > { %s951_s8 = scalar_lea.vmem %s1831_s23, %s1193_s26 [#allocation8]   ;;  %s953_s16 = scalar_lea.vmem %s1844_s15, %s1193_s26  }
 0x329   : > { %p1186_p1 = scmp.le.s32.totalorder %s1875_s17, 0 }
 0x32a   : > { %s1574_s22 = smov (!%p1186_p1), %s953_s16   ;;  %s1578_s24 = smov (!%p1186_p1), %s951_s8  }
 0x32b   : > { %1053 = sbr.rel (%p1186_p1) target bundleno = 828 (0x33c), region = 161  ;;  %s1582_s25 = smov (!%p1186_p1), 0  }
 0x32c   : > { %s1586_s11 = smov (!%p1186_p1), 0  }
 0x332 LB: >> { %v963_v33 = vld [vmem:[%s1580_s24] sm:$0xff]  ;;  %s965_s19 = sadd.s32 1, %s1584_s25  ;;  %s957_s11 = sadd.s32 1, %s1588_s11   ;;  %s1588_s11 = sphi %s1586_s11, %s957_s11   ;;  %s1584_s25 = sphi %s1582_s25, %s1583_s25   ;;  %s1580_s24 = sphi %s1578_s24, %s970_s24   ;;  %s1576_s22 = sphi %s1574_s22, %s971_s22  }
 0x333   : >> { %964 = vst [vmem:[%s1576_s22] sm:$0xff] %v963_v33  ;;  %p966_p5 = scmp.ge.s32.totalorder %s965_s19, %s1875_s17  ;;  %p956_p8 = scmp.ge.s32.totalorder %s957_s11, %s1875_s17 }
 0x335   : >> { %s1932_s19 = smov (%p966_p5, %s965_s19), 0  ;;  %959 = sbr.rel (!%p956_p8) target bundleno = 818 (0x332), region = 167 }
 0x336   : >> { %s1187_s23 = sshll.u32 %s1932_s19, 3  ;;  %s1583_s25 = smov %s1932_s19  }
 0x337   : >> { %s970_s24 = scalar_lea.vmem %s951_s8, %s1187_s23 [#allocation8]   ;;  %s971_s22 = scalar_lea.vmem %s953_s16, %s1187_s23  }
 0x33c PF: > { %p19_p11 = scmp.ge.s32.totalorder %s1663_s30, 4   ;;  %s1921_s26 = smov %s1548_s27 }
 0x33d   : > { %s1922_s27 = smov %s1552_s28  ;;  %s1923_s28 = smov %s1673_s10 }
 0x33e   : > { %s1924_s29 = smov %s1663_s30  ;;  %21 = sbr.rel (!%p19_p11) target bundleno = 6 (0x6), region = 178 }
 0x345   :  { %987 = vsyncpa [#allocation4], 1 }
 0x346   :  { %989 = vsyncpa [#allocation4 + $0x1], 1 }
 0x347   :  { %990 = vsyncpa [#allocation6], 1 }

</bundles_post_ra>
